<compile_context>
chip_gen: v7x
topology: tpu7x:2x2x1
jax: 0.10.0
libtpu: 0.0.40
codegen_flags: <defaults>
</compile_context>

<pallas_src>
import math
import jax
import jax.numpy as jnp
from jax.experimental import pallas as pl
from jax.experimental.pallas import tpu as pltpu


# ----------------------------- in-kernel math helpers -----------------------------

def _gelu_tanh(x):
    # tanh-form GELU (== torch.nn.GELU(approximate='tanh')): one EUP tanh instead of a
    # ~10-op erf polynomial on the 4-wide VALU.  Max deviation from exact-erf GELU ~1e-3.
    c = math.sqrt(2.0 / math.pi)
    return 0.5 * x * (1.0 + jnp.tanh(c * (x + 0.044715 * (x * x * x))))


def _layernorm(x, g, b, eps=1e-12):
    mu = jnp.mean(x, axis=-1, keepdims=True)
    var = jnp.mean(jnp.square(x - mu), axis=-1, keepdims=True)
    return (x - mu) * jax.lax.rsqrt(var + eps) * g + b


# rows of the packed [11, D] small-parameter array
_ROW_LN0_G, _ROW_LN0_B = 0, 1
_ROW_BQ, _ROW_BK, _ROW_BV, _ROW_BO = 2, 3, 4, 5
_ROW_LN1_G, _ROW_LN1_B = 6, 7
_ROW_B2 = 8
_ROW_LN2_G, _ROW_LN2_B = 9, 10


# ----------------------------------- kernel ---------------------------------------

def text_encoder_kernel(h_ref, m_ref, pD_ref,
                        wq_ref, wkv_ref, wo_ref, w1_ref, b1_ref, w2_ref,
                        fcw_ref, fcb_ref,
                        out_ref):
    x = h_ref[...]                     # [Bb, L, D] f32  word + position embeddings
    mask = m_ref[...]                  # [Bb, 1, L] f32  1.0 = attend, 0.0 = padding
    pD = pD_ref[...]                   # [11, D]    f32  packed LN params + small biases
    D = x.shape[-1]
    bf = jnp.bfloat16

    # embedding LayerNorm over every token (K / V need all of them)
    x = _layernorm(x, pD[_ROW_LN0_G], pD[_ROW_LN0_B])

    # Only the CLS (position-0) row of the final hidden states feeds the head, and this
    # BERT is single-layer, so all downstream per-token work uses just the CLS row.
    # (With a multi-layer BERT only the LAST layer could be restricted like this.)
    x0 = x[:, 0:1, :]                  # [Bb, 1, D]  CLS row, kept 3-D for batched einsums

    # --- single-head self-attention (synthetic BERT layer) ---
    # K/V projection fused into one [D, 2D] matmul over all tokens
    kv = jnp.einsum("bld,de->ble", x.astype(bf), wkv_ref[...],
                    preferred_element_type=jnp.float32)                # [Bb, L, 2D]
    k = kv[:, :, 0 * D:1 * D] + pD[_ROW_BK]
    v = kv[:, :, 1 * D:2 * D] + pD[_ROW_BV]

    # Q projection for the CLS query only (wq and bq pre-scaled by 1/sqrt(D) in the wrapper
    # -> no explicit score scale)
    q = jnp.einsum("bld,de->ble", x0.astype(bf), wq_ref[...],
                   preferred_element_type=jnp.float32) + pD[_ROW_BQ]   # [Bb, 1, D]

    scores = jnp.einsum("bqd,bkd->bqk", q.astype(bf), k.astype(bf),
                        preferred_element_type=jnp.float32)            # [Bb, 1, L]
    scores = scores + (mask - 1.0) * 1e9                               # additive attn mask
    scores = scores - jnp.max(scores, axis=-1, keepdims=True)
    e = jnp.exp(scores)
    probs = e * pl.reciprocal(jnp.sum(e, axis=-1, keepdims=True), approx=True)

    ctx = jnp.einsum("bqk,bkd->bqd", probs.astype(bf), v.astype(bf),
                     preferred_element_type=jnp.float32)               # [Bb, 1, D]
    attn = jnp.einsum("bld,de->ble", ctx.astype(bf), wo_ref[...],
                      preferred_element_type=jnp.float32) + pD[_ROW_BO]
    y = _layernorm(x0 + attn, pD[_ROW_LN1_G], pD[_ROW_LN1_B])          # [Bb, 1, D]

    # --- feed-forward (CLS row only) ---
    hdn = _gelu_tanh(jnp.einsum("bld,df->blf", y.astype(bf), w1_ref[...],
                                preferred_element_type=jnp.float32) + b1_ref[...])
    ffn = jnp.einsum("blf,fd->bld", hdn.astype(bf), w2_ref[...],
                     preferred_element_type=jnp.float32) + pD[_ROW_B2]
    y = _layernorm(y + ffn, pD[_ROW_LN2_G], pD[_ROW_LN2_B])            # [Bb, 1, D]

    # --- Text_Encoder head: GELU(fc(hidden_states[:, 0])) -> lane-dense [Bb, E_pad] ---
    cls = y[:, 0, :]                                                   # [Bb, D]
    out = jnp.dot(cls.astype(bf), fcw_ref[...],
                  preferred_element_type=jnp.float32) + fcb_ref[...]
    out_ref[...] = _gelu_tanh(out)                                     # [Bb, E_pad]


# ----------------------------------- wrapper ---------------------------------------

def text_encoder_forward(text, params, *, batch_block=None):
    B, two_L = text.shape
    L = two_L // 2
    ids = text[:, :L]                                   # torch.narrow(text, 1, 0, L)
    attmask = text[:, L:].astype(jnp.float32)           # torch.narrow(text, 1, L, L)

    D = params["word_emb"].shape[1]
    E = params["fc_w"].shape[1]
    E_pad = pl.cdiv(E, 128) * 128                       # lane-dense (unmasked) stores

    # Whole batch in one grid step by default (launch-overhead-bound at these shapes).
    # On v7x (2 TensorCores) with larger batches, pass batch_block=B//2 so the
    # 'parallel' grid axis shards across both cores.
    Bb = B if batch_block is None else batch_block
    assert B % Bb == 0

    # glue: data-dependent embedding-table gather stays in plain JAX
    # TODO(synk): a fully-in-Pallas version would need a manual DMA gather over the vocab table.
    h = params["word_emb"][ids] + params["pos_emb"][None, :L, :]       # [B, L, D] f32
    m = attmask[:, None, :]                                            # [B, 1, L] f32

    scale = 1.0 / math.sqrt(D)
    # attention scale constant-folded into the Q projection; K/V fused into one matmul
    wq = params["wq"] * scale
    wkv = jnp.concatenate([params["wk"], params["wv"]], axis=1)
    packD = jnp.concatenate([
        params["ln0_g"], params["ln0_b"],
        params["bq"] * scale, params["bk"], params["bv"], params["bo"],
        params["ln1_g"], params["ln1_b"],
        params["b2"],
        params["ln2_g"], params["ln2_b"],
    ], axis=0)                                                         # [11, D] f32

    # pad the fc head to a multiple of 128 lanes; slice back outside the kernel
    fcw = jnp.pad(params["fc_w"], ((0, 0), (0, E_pad - E)))
    fcb = jnp.pad(params["fc_b"], ((0, 0), (0, E_pad - E)))

    bf = jnp.bfloat16
    weights = [packD,                       # [11, D]   f32
               wq.astype(bf),               # [D, D]    bf16
               wkv.astype(bf),              # [D, 2D]   bf16
               params["wo"].astype(bf),     # [D, D]    bf16
               params["w1"].astype(bf),     # [D, F]    bf16
               params["b1"],                # [1, F]    f32
               params["w2"].astype(bf),     # [F, D]    bf16
               fcw.astype(bf),              # [D, Epad] bf16
               fcb]                         # [1, Epad] f32
    w_specs = [pl.BlockSpec(w.shape, lambda b: (0, 0)) for w in weights]

    out = pl.pallas_call(
        text_encoder_kernel,
        out_shape=jax.ShapeDtypeStruct((B, E_pad), jnp.float32),
        grid_spec=pltpu.PrefetchScalarGridSpec(
            num_scalar_prefetch=0,
            grid=(B // Bb,),
            in_specs=[pl.BlockSpec((Bb, L, D), lambda b: (b, 0, 0)),
                      pl.BlockSpec((Bb, 1, L), lambda b: (b, 0, 0))] + w_specs,
            out_specs=pl.BlockSpec((Bb, E_pad), lambda b: (b, 0)),
        ),
        compiler_params=pltpu.CompilerParams(
            dimension_semantics=("parallel",)),
    )(h, m, *weights)
    return out[:, :E]                                                  # [B, E]


# ------------------------------ deterministic params -------------------------------

def init_params(key, *, vocab, max_len, D, F, E):
    ks = jax.random.split(key, 12)

    def nrm(k, shape, s):
        return (s * jax.random.normal(k, shape)).astype(jnp.float32)

    z = lambda s: jnp.zeros(s, jnp.float32)
    o = lambda s: jnp.ones(s, jnp.float32)

    return {
        "word_emb": nrm(ks[0], (vocab, D), 0.02),
        "pos_emb":  nrm(ks[1], (max_len, D), 0.02),
        "ln0_g": o((1, D)), "ln0_b": z((1, D)),
        "wq": nrm(ks[2], (D, D), 1.0 / math.sqrt(D)), "bq": z((1, D)),
        "wk": nrm(ks[3], (D, D), 1.0 / math.sqrt(D)), "bk": z((1, D)),
        "wv": nrm(ks[4], (D, D), 1.0 / math.sqrt(D)), "bv": z((1, D)),
        "wo": nrm(ks[5], (D, D), 1.0 / math.sqrt(D)), "bo": z((1, D)),
        "ln1_g": o((1, D)), "ln1_b": z((1, D)),
        "w1": nrm(ks[6], (D, F), 1.0 / math.sqrt(D)), "b1": z((1, F)),
        "w2": nrm(ks[7], (F, D), 1.0 / math.sqrt(F)), "b2": z((1, D)),
        "ln2_g": o((1, D)), "ln2_b": z((1, D)),
        # nn.Linear(word_embedding_dim, item_embedding_dim)
        "fc_w": nrm(ks[8], (D, E), math.sqrt(2.0 / (D + E))),
        "fc_b": z((1, E)),
    }


# -------------------------------------- main ---------------------------------------

if __name__ == "__main__":
    B = 2            # batch
    L = 8            # num_words (text has 2*L columns: ids || mask)
    D = 32           # word_embedding_dim (BERT hidden size)
    E = 64           # item_embedding_dim
    F = 4 * D        # FFN intermediate
    VOCAB = 100

    params = init_params(jax.random.PRNGKey(0), vocab=VOCAB, max_len=L, D=D, F=F, E=E)

    k_ids, _ = jax.random.split(jax.random.PRNGKey(1))
    ids = jax.random.randint(k_ids, (B, L), 0, VOCAB, dtype=jnp.int32)
    lengths = jnp.array([L, L // 2], dtype=jnp.int32)
    attmask = (jnp.arange(L)[None, :] < lengths[:, None]).astype(jnp.int32)
    text = jnp.concatenate([ids, attmask], axis=1)     # [B, 2*L] int32

    out = text_encoder_forward(text, params)
    out = jax.block_until_ready(out)
    assert out.shape == (B, E) and out.dtype == jnp.float32
    print("KERNEL_OK")
</pallas_src>

<mosaic_0001>
module attributes {stable_mosaic.version = 11 : i64} {
  func.func @text_encoder_kernel(%arg0: i32, %arg1: memref<2x8x32xf32, #tpu.memory_space<vmem>>, %arg2: memref<2x1x8xf32, #tpu.memory_space<vmem>>, %arg3: memref<11x32xf32, #tpu.memory_space<vmem>>, %arg4: memref<32x32xbf16, #tpu.memory_space<vmem>>, %arg5: memref<32x64xbf16, #tpu.memory_space<vmem>>, %arg6: memref<32x32xbf16, #tpu.memory_space<vmem>>, %arg7: memref<32x128xbf16, #tpu.memory_space<vmem>>, %arg8: memref<1x128xf32, #tpu.memory_space<vmem>>, %arg9: memref<128x32xbf16, #tpu.memory_space<vmem>>, %arg10: memref<32x128xbf16, #tpu.memory_space<vmem>>, %arg11: memref<1x128xf32, #tpu.memory_space<vmem>>, %arg12: memref<2x128xf32, #tpu.memory_space<vmem>>) attributes {dimension_semantics = [#tpu.dimension_semantics<parallel>], iteration_bounds = array<i64: 1>, scalar_prefetch = 0 : i64, scratch_operands = 0 : i64, tpu.core_type = #tpu.core_type<tc>, window_params = [{transform_indices = @transform_0, window_bounds = array<i64: 2, 8, 32>}, {transform_indices = @transform_1, window_bounds = array<i64: 2, 1, 8>}, {pipeline_mode = #tpu.pipeline_mode<synchronous>, transform_indices = @transform_2, window_bounds = array<i64: 11, 32>}, {pipeline_mode = #tpu.pipeline_mode<synchronous>, transform_indices = @transform_3, window_bounds = array<i64: 32, 32>}, {pipeline_mode = #tpu.pipeline_mode<synchronous>, transform_indices = @transform_4, window_bounds = array<i64: 32, 64>}, {pipeline_mode = #tpu.pipeline_mode<synchronous>, transform_indices = @transform_5, window_bounds = array<i64: 32, 32>}, {pipeline_mode = #tpu.pipeline_mode<synchronous>, transform_indices = @transform_6, window_bounds = array<i64: 32, 128>}, {pipeline_mode = #tpu.pipeline_mode<synchronous>, transform_indices = @transform_7, window_bounds = array<i64: 1, 128>}, {pipeline_mode = #tpu.pipeline_mode<synchronous>, transform_indices = @transform_8, window_bounds = array<i64: 128, 32>}, {pipeline_mode = #tpu.pipeline_mode<synchronous>, transform_indices = @transform_9, window_bounds = array<i64: 32, 128>}, {pipeline_mode = #tpu.pipeline_mode<synchronous>, transform_indices = @transform_10, window_bounds = array<i64: 1, 128>}, {transform_indices = @transform_11, window_bounds = array<i64: 2, 128>}]} {
    %c0 = arith.constant 0 : index
    %c0_0 = arith.constant 0 : index
    %c0_1 = arith.constant 0 : index
    %0 = vector.load %arg1[%c0, %c0_0, %c0_1] : memref<2x8x32xf32, #tpu.memory_space<vmem>>, vector<2x8x32xf32>
    %c0_2 = arith.constant 0 : index
    %c0_3 = arith.constant 0 : index
    %c0_4 = arith.constant 0 : index
    %1 = vector.load %arg2[%c0_2, %c0_3, %c0_4] : memref<2x1x8xf32, #tpu.memory_space<vmem>>, vector<2x1x8xf32>
    %c0_5 = arith.constant 0 : index
    %c0_6 = arith.constant 0 : index
    %2 = vector.load %arg3[%c0_5, %c0_6] : memref<11x32xf32, #tpu.memory_space<vmem>>, vector<11x32xf32>
    %3 = vector.extract_strided_slice %2 {offsets = [0, 0], sizes = [1, 32], strides = [1, 1]} : vector<11x32xf32> to vector<1x32xf32>
    %4 = vector.shape_cast %3 : vector<1x32xf32> to vector<32xf32>
    %5 = vector.extract_strided_slice %2 {offsets = [1, 0], sizes = [1, 32], strides = [1, 1]} : vector<11x32xf32> to vector<1x32xf32>
    %6 = vector.shape_cast %5 : vector<1x32xf32> to vector<32xf32>
    %cst = arith.constant dense<0.000000e+00> : vector<2x8xf32>
    %7 = vector.multi_reduction <add>, %0, %cst [2] : vector<2x8x32xf32> to vector<2x8xf32>
    %8 = vector.shape_cast %7 : vector<2x8xf32> to vector<2x8x1xf32>
    %cst_7 = arith.constant 3.200000e+01 : f32
    %9 = vector.broadcast %cst_7 : f32 to vector<2x8x1xf32>
    %10 = arith.divf %8, %9 : vector<2x8x1xf32>
    %11 = vector.broadcast %10 : vector<2x8x1xf32> to vector<2x8x32xf32>
    %12 = arith.subf %0, %11 : vector<2x8x32xf32>
    %13 = arith.mulf %12, %12 : vector<2x8x32xf32>
    %cst_8 = arith.constant dense<0.000000e+00> : vector<2x8xf32>
    %14 = vector.multi_reduction <add>, %13, %cst_8 [2] : vector<2x8x32xf32> to vector<2x8xf32>
    %15 = vector.shape_cast %14 : vector<2x8xf32> to vector<2x8x1xf32>
    %cst_9 = arith.constant 3.200000e+01 : f32
    %16 = vector.broadcast %cst_9 : f32 to vector<2x8x1xf32>
    %17 = arith.divf %15, %16 : vector<2x8x1xf32>
    %18 = vector.broadcast %10 : vector<2x8x1xf32> to vector<2x8x32xf32>
    %19 = arith.subf %0, %18 : vector<2x8x32xf32>
    %cst_10 = arith.constant 9.99999996E-13 : f32
    %20 = vector.broadcast %cst_10 : f32 to vector<2x8x1xf32>
    %21 = arith.addf %17, %20 : vector<2x8x1xf32>
    %22 = math.rsqrt %21 : vector<2x8x1xf32>
    %23 = vector.broadcast %22 : vector<2x8x1xf32> to vector<2x8x32xf32>
    %24 = arith.mulf %19, %23 : vector<2x8x32xf32>
    %25 = vector.shape_cast %4 : vector<32xf32> to vector<1x1x32xf32>
    %26 = vector.broadcast %25 : vector<1x1x32xf32> to vector<2x8x32xf32>
    %27 = arith.mulf %24, %26 : vector<2x8x32xf32>
    %28 = vector.shape_cast %6 : vector<32xf32> to vector<1x1x32xf32>
    %29 = vector.broadcast %28 : vector<1x1x32xf32> to vector<2x8x32xf32>
    %30 = arith.addf %27, %29 : vector<2x8x32xf32>
    %31 = vector.extract_strided_slice %30 {offsets = [0, 0, 0], sizes = [2, 1, 32], strides = [1, 1, 1]} : vector<2x8x32xf32> to vector<2x1x32xf32>
    %32 = arith.truncf %30 : vector<2x8x32xf32> to vector<2x8x32xbf16>
    %c0_11 = arith.constant 0 : index
    %c0_12 = arith.constant 0 : index
    %33 = vector.load %arg5[%c0_11, %c0_12] : memref<32x64xbf16, #tpu.memory_space<vmem>>, vector<32x64xbf16>
    "tpu.trace_start"() <{level = 10 : i32, message = "bld,de->ble"}> : () -> ()
    %cst_13 = arith.constant dense<0.000000e+00> : vector<2x8x64xf32>
    %34 = tpu.matmul %32, %33, %cst_13 {dimension_numbers = #tpu.dot_dimension_numbers<[2], [0], [0, 1], [1], [0, 0, 0, 1, 1, 1], [], []>} : vector<2x8x32xbf16>, vector<32x64xbf16>, vector<2x8x64xf32> -> vector<2x8x64xf32>
    "tpu.trace_stop"() : () -> ()
    %35 = vector.extract_strided_slice %34 {offsets = [0, 0, 0], sizes = [2, 8, 32], strides = [1, 1, 1]} : vector<2x8x64xf32> to vector<2x8x32xf32>
    %36 = vector.extract_strided_slice %2 {offsets = [3, 0], sizes = [1, 32], strides = [1, 1]} : vector<11x32xf32> to vector<1x32xf32>
    %37 = vector.shape_cast %36 : vector<1x32xf32> to vector<32xf32>
    %38 = vector.shape_cast %37 : vector<32xf32> to vector<1x1x32xf32>
    %39 = vector.broadcast %38 : vector<1x1x32xf32> to vector<2x8x32xf32>
    %40 = arith.addf %35, %39 : vector<2x8x32xf32>
    %41 = vector.extract_strided_slice %34 {offsets = [0, 0, 32], sizes = [2, 8, 32], strides = [1, 1, 1]} : vector<2x8x64xf32> to vector<2x8x32xf32>
    %42 = vector.extract_strided_slice %2 {offsets = [4, 0], sizes = [1, 32], strides = [1, 1]} : vector<11x32xf32> to vector<1x32xf32>
    %43 = vector.shape_cast %42 : vector<1x32xf32> to vector<32xf32>
    %44 = vector.shape_cast %43 : vector<32xf32> to vector<1x1x32xf32>
    %45 = vector.broadcast %44 : vector<1x1x32xf32> to vector<2x8x32xf32>
    %46 = arith.addf %41, %45 : vector<2x8x32xf32>
    %47 = arith.truncf %31 : vector<2x1x32xf32> to vector<2x1x32xbf16>
    %c0_14 = arith.constant 0 : index
    %c0_15 = arith.constant 0 : index
    %48 = vector.load %arg4[%c0_14, %c0_15] : memref<32x32xbf16, #tpu.memory_space<vmem>>, vector<32x32xbf16>
    "tpu.trace_start"() <{level = 10 : i32, message = "bld,de->ble"}> : () -> ()
    %cst_16 = arith.constant dense<0.000000e+00> : vector<2x1x32xf32>
    %49 = tpu.matmul %47, %48, %cst_16 {dimension_numbers = #tpu.dot_dimension_numbers<[2], [0], [0, 1], [1], [0, 0, 0, 1, 1, 1], [], []>} : vector<2x1x32xbf16>, vector<32x32xbf16>, vector<2x1x32xf32> -> vector<2x1x32xf32>
    "tpu.trace_stop"() : () -> ()
    %50 = vector.extract_strided_slice %2 {offsets = [2, 0], sizes = [1, 32], strides = [1, 1]} : vector<11x32xf32> to vector<1x32xf32>
    %51 = vector.shape_cast %50 : vector<1x32xf32> to vector<32xf32>
    %52 = vector.shape_cast %51 : vector<32xf32> to vector<1x1x32xf32>
    %53 = vector.broadcast %52 : vector<1x1x32xf32> to vector<2x1x32xf32>
    %54 = arith.addf %49, %53 : vector<2x1x32xf32>
    %55 = arith.truncf %54 : vector<2x1x32xf32> to vector<2x1x32xbf16>
    %56 = arith.truncf %40 : vector<2x8x32xf32> to vector<2x8x32xbf16>
    "tpu.trace_start"() <{level = 10 : i32, message = "bqd,bkd->bqk"}> : () -> ()
    %cst_17 = arith.constant dense<0.000000e+00> : vector<2x1x8xf32>
    %57 = tpu.matmul %55, %56, %cst_17 {dimension_numbers = #tpu.dot_dimension_numbers<[2], [2], [1], [1], [0, 0, 0, 1, 1, 1], [0], [0]>} : vector<2x1x32xbf16>, vector<2x8x32xbf16>, vector<2x1x8xf32> -> vector<2x1x8xf32>
    "tpu.trace_stop"() : () -> ()
    %cst_18 = arith.constant 1.000000e+00 : f32
    %58 = vector.broadcast %cst_18 : f32 to vector<2x1x8xf32>
    %59 = arith.subf %1, %58 : vector<2x1x8xf32>
    %cst_19 = arith.constant 1.000000e+09 : f32
    %60 = vector.broadcast %cst_19 : f32 to vector<2x1x8xf32>
    %61 = arith.mulf %59, %60 : vector<2x1x8xf32>
    %62 = arith.addf %57, %61 : vector<2x1x8xf32>
    %cst_20 = arith.constant dense<0xFF800000> : vector<2x1xf32>
    %63 = vector.multi_reduction <maximumf>, %62, %cst_20 [2] : vector<2x1x8xf32> to vector<2x1xf32>
    %64 = vector.shape_cast %63 : vector<2x1xf32> to vector<2x1x1xf32>
    %65 = vector.broadcast %64 : vector<2x1x1xf32> to vector<2x1x8xf32>
    %66 = arith.subf %62, %65 : vector<2x1x8xf32>
    %67 = math.exp %66 : vector<2x1x8xf32>
    %cst_21 = arith.constant dense<0.000000e+00> : vector<2x1xf32>
    %68 = vector.multi_reduction <add>, %67, %cst_21 [2] : vector<2x1x8xf32> to vector<2x1xf32>
    %69 = vector.shape_cast %68 : vector<2x1xf32> to vector<2x1x1xf32>
    %70 = tpu.reciprocal %69 {approx = true} : vector<2x1x1xf32> -> vector<2x1x1xf32>
    %71 = vector.broadcast %70 : vector<2x1x1xf32> to vector<2x1x8xf32>
    %72 = arith.mulf %67, %71 : vector<2x1x8xf32>
    %73 = arith.truncf %72 : vector<2x1x8xf32> to vector<2x1x8xbf16>
    %74 = arith.truncf %46 : vector<2x8x32xf32> to vector<2x8x32xbf16>
    "tpu.trace_start"() <{level = 10 : i32, message = "bqk,bkd->bqd"}> : () -> ()
    %cst_22 = arith.constant dense<0.000000e+00> : vector<2x1x32xf32>
    %75 = tpu.matmul %73, %74, %cst_22 {dimension_numbers = #tpu.dot_dimension_numbers<[2], [1], [1], [2], [0, 0, 0, 1, 1, 2], [0], [0]>} : vector<2x1x8xbf16>, vector<2x8x32xbf16>, vector<2x1x32xf32> -> vector<2x1x32xf32>
    "tpu.trace_stop"() : () -> ()
    %76 = arith.truncf %75 : vector<2x1x32xf32> to vector<2x1x32xbf16>
    %c0_23 = arith.constant 0 : index
    %c0_24 = arith.constant 0 : index
    %77 = vector.load %arg6[%c0_23, %c0_24] : memref<32x32xbf16, #tpu.memory_space<vmem>>, vector<32x32xbf16>
    "tpu.trace_start"() <{level = 10 : i32, message = "bld,de->ble"}> : () -> ()
    %cst_25 = arith.constant dense<0.000000e+00> : vector<2x1x32xf32>
    %78 = tpu.matmul %76, %77, %cst_25 {dimension_numbers = #tpu.dot_dimension_numbers<[2], [0], [0, 1], [1], [0, 0, 0, 1, 1, 1], [], []>} : vector<2x1x32xbf16>, vector<32x32xbf16>, vector<2x1x32xf32> -> vector<2x1x32xf32>
    "tpu.trace_stop"() : () -> ()
    %79 = vector.extract_strided_slice %2 {offsets = [5, 0], sizes = [1, 32], strides = [1, 1]} : vector<11x32xf32> to vector<1x32xf32>
    %80 = vector.shape_cast %79 : vector<1x32xf32> to vector<32xf32>
    %81 = vector.shape_cast %80 : vector<32xf32> to vector<1x1x32xf32>
    %82 = vector.broadcast %81 : vector<1x1x32xf32> to vector<2x1x32xf32>
    %83 = arith.addf %78, %82 : vector<2x1x32xf32>
    %84 = arith.addf %31, %83 : vector<2x1x32xf32>
    %85 = vector.extract_strided_slice %2 {offsets = [6, 0], sizes = [1, 32], strides = [1, 1]} : vector<11x32xf32> to vector<1x32xf32>
    %86 = vector.shape_cast %85 : vector<1x32xf32> to vector<32xf32>
    %87 = vector.extract_strided_slice %2 {offsets = [7, 0], sizes = [1, 32], strides = [1, 1]} : vector<11x32xf32> to vector<1x32xf32>
    %88 = vector.shape_cast %87 : vector<1x32xf32> to vector<32xf32>
    %cst_26 = arith.constant dense<0.000000e+00> : vector<2x1xf32>
    %89 = vector.multi_reduction <add>, %84, %cst_26 [2] : vector<2x1x32xf32> to vector<2x1xf32>
    %90 = vector.shape_cast %89 : vector<2x1xf32> to vector<2x1x1xf32>
    %cst_27 = arith.constant 3.200000e+01 : f32
    %91 = vector.broadcast %cst_27 : f32 to vector<2x1x1xf32>
    %92 = arith.divf %90, %91 : vector<2x1x1xf32>
    %93 = vector.broadcast %92 : vector<2x1x1xf32> to vector<2x1x32xf32>
    %94 = arith.subf %84, %93 : vector<2x1x32xf32>
    %95 = arith.mulf %94, %94 : vector<2x1x32xf32>
    %cst_28 = arith.constant dense<0.000000e+00> : vector<2x1xf32>
    %96 = vector.multi_reduction <add>, %95, %cst_28 [2] : vector<2x1x32xf32> to vector<2x1xf32>
    %97 = vector.shape_cast %96 : vector<2x1xf32> to vector<2x1x1xf32>
    %cst_29 = arith.constant 3.200000e+01 : f32
    %98 = vector.broadcast %cst_29 : f32 to vector<2x1x1xf32>
    %99 = arith.divf %97, %98 : vector<2x1x1xf32>
    %100 = vector.broadcast %92 : vector<2x1x1xf32> to vector<2x1x32xf32>
    %101 = arith.subf %84, %100 : vector<2x1x32xf32>
    %cst_30 = arith.constant 9.99999996E-13 : f32
    %102 = vector.broadcast %cst_30 : f32 to vector<2x1x1xf32>
    %103 = arith.addf %99, %102 : vector<2x1x1xf32>
    %104 = math.rsqrt %103 : vector<2x1x1xf32>
    %105 = vector.broadcast %104 : vector<2x1x1xf32> to vector<2x1x32xf32>
    %106 = arith.mulf %101, %105 : vector<2x1x32xf32>
    %107 = vector.shape_cast %86 : vector<32xf32> to vector<1x1x32xf32>
    %108 = vector.broadcast %107 : vector<1x1x32xf32> to vector<2x1x32xf32>
    %109 = arith.mulf %106, %108 : vector<2x1x32xf32>
    %110 = vector.shape_cast %88 : vector<32xf32> to vector<1x1x32xf32>
    %111 = vector.broadcast %110 : vector<1x1x32xf32> to vector<2x1x32xf32>
    %112 = arith.addf %109, %111 : vector<2x1x32xf32>
    %113 = arith.truncf %112 : vector<2x1x32xf32> to vector<2x1x32xbf16>
    %c0_31 = arith.constant 0 : index
    %c0_32 = arith.constant 0 : index
    %114 = vector.load %arg7[%c0_31, %c0_32] : memref<32x128xbf16, #tpu.memory_space<vmem>>, vector<32x128xbf16>
    "tpu.trace_start"() <{level = 10 : i32, message = "bld,df->blf"}> : () -> ()
    %cst_33 = arith.constant dense<0.000000e+00> : vector<2x1x128xf32>
    %115 = tpu.matmul %113, %114, %cst_33 {dimension_numbers = #tpu.dot_dimension_numbers<[2], [0], [0, 1], [1], [0, 0, 0, 1, 1, 1], [], []>} : vector<2x1x32xbf16>, vector<32x128xbf16>, vector<2x1x128xf32> -> vector<2x1x128xf32>
    "tpu.trace_stop"() : () -> ()
    %c0_34 = arith.constant 0 : index
    %c0_35 = arith.constant 0 : index
    %116 = vector.load %arg8[%c0_34, %c0_35] : memref<1x128xf32, #tpu.memory_space<vmem>>, vector<1x128xf32>
    %117 = vector.shape_cast %116 : vector<1x128xf32> to vector<1x1x128xf32>
    %118 = vector.broadcast %117 : vector<1x1x128xf32> to vector<2x1x128xf32>
    %119 = arith.addf %115, %118 : vector<2x1x128xf32>
    %cst_36 = arith.constant 5.000000e-01 : f32
    %120 = vector.broadcast %cst_36 : f32 to vector<2x1x128xf32>
    %121 = arith.mulf %120, %119 : vector<2x1x128xf32>
    %122 = arith.mulf %119, %119 : vector<2x1x128xf32>
    %123 = arith.mulf %122, %119 : vector<2x1x128xf32>
    %cst_37 = arith.constant 4.471500e-02 : f32
    %124 = vector.broadcast %cst_37 : f32 to vector<2x1x128xf32>
    %125 = arith.mulf %124, %123 : vector<2x1x128xf32>
    %126 = arith.addf %119, %125 : vector<2x1x128xf32>
    %cst_38 = arith.constant 0.797884583 : f32
    %127 = vector.broadcast %cst_38 : f32 to vector<2x1x128xf32>
    %128 = arith.mulf %127, %126 : vector<2x1x128xf32>
    %129 = math.tanh %128 : vector<2x1x128xf32>
    %cst_39 = arith.constant 1.000000e+00 : f32
    %130 = vector.broadcast %cst_39 : f32 to vector<2x1x128xf32>
    %131 = arith.addf %130, %129 : vector<2x1x128xf32>
    %132 = arith.mulf %121, %131 : vector<2x1x128xf32>
    %133 = arith.truncf %132 : vector<2x1x128xf32> to vector<2x1x128xbf16>
    %c0_40 = arith.constant 0 : index
    %c0_41 = arith.constant 0 : index
    %134 = vector.load %arg9[%c0_40, %c0_41] : memref<128x32xbf16, #tpu.memory_space<vmem>>, vector<128x32xbf16>
    "tpu.trace_start"() <{level = 10 : i32, message = "blf,fd->bld"}> : () -> ()
    %cst_42 = arith.constant dense<0.000000e+00> : vector<2x1x32xf32>
    %135 = tpu.matmul %133, %134, %cst_42 {dimension_numbers = #tpu.dot_dimension_numbers<[2], [0], [0, 1], [1], [0, 0, 0, 1, 1, 1], [], []>} : vector<2x1x128xbf16>, vector<128x32xbf16>, vector<2x1x32xf32> -> vector<2x1x32xf32>
    "tpu.trace_stop"() : () -> ()
    %136 = vector.extract_strided_slice %2 {offsets = [8, 0], sizes = [1, 32], strides = [1, 1]} : vector<11x32xf32> to vector<1x32xf32>
    %137 = vector.shape_cast %136 : vector<1x32xf32> to vector<32xf32>
    %138 = vector.shape_cast %137 : vector<32xf32> to vector<1x1x32xf32>
    %139 = vector.broadcast %138 : vector<1x1x32xf32> to vector<2x1x32xf32>
    %140 = arith.addf %135, %139 : vector<2x1x32xf32>
    %141 = arith.addf %112, %140 : vector<2x1x32xf32>
    %142 = vector.extract_strided_slice %2 {offsets = [9, 0], sizes = [1, 32], strides = [1, 1]} : vector<11x32xf32> to vector<1x32xf32>
    %143 = vector.shape_cast %142 : vector<1x32xf32> to vector<32xf32>
    %144 = vector.extract_strided_slice %2 {offsets = [10, 0], sizes = [1, 32], strides = [1, 1]} : vector<11x32xf32> to vector<1x32xf32>
    %145 = vector.shape_cast %144 : vector<1x32xf32> to vector<32xf32>
    %cst_43 = arith.constant dense<0.000000e+00> : vector<2x1xf32>
    %146 = vector.multi_reduction <add>, %141, %cst_43 [2] : vector<2x1x32xf32> to vector<2x1xf32>
    %147 = vector.shape_cast %146 : vector<2x1xf32> to vector<2x1x1xf32>
    %cst_44 = arith.constant 3.200000e+01 : f32
    %148 = vector.broadcast %cst_44 : f32 to vector<2x1x1xf32>
    %149 = arith.divf %147, %148 : vector<2x1x1xf32>
    %150 = vector.broadcast %149 : vector<2x1x1xf32> to vector<2x1x32xf32>
    %151 = arith.subf %141, %150 : vector<2x1x32xf32>
    %152 = arith.mulf %151, %151 : vector<2x1x32xf32>
    %cst_45 = arith.constant dense<0.000000e+00> : vector<2x1xf32>
    %153 = vector.multi_reduction <add>, %152, %cst_45 [2] : vector<2x1x32xf32> to vector<2x1xf32>
    %154 = vector.shape_cast %153 : vector<2x1xf32> to vector<2x1x1xf32>
    %cst_46 = arith.constant 3.200000e+01 : f32
    %155 = vector.broadcast %cst_46 : f32 to vector<2x1x1xf32>
    %156 = arith.divf %154, %155 : vector<2x1x1xf32>
    %157 = vector.broadcast %149 : vector<2x1x1xf32> to vector<2x1x32xf32>
    %158 = arith.subf %141, %157 : vector<2x1x32xf32>
    %cst_47 = arith.constant 9.99999996E-13 : f32
    %159 = vector.broadcast %cst_47 : f32 to vector<2x1x1xf32>
    %160 = arith.addf %156, %159 : vector<2x1x1xf32>
    %161 = math.rsqrt %160 : vector<2x1x1xf32>
    %162 = vector.broadcast %161 : vector<2x1x1xf32> to vector<2x1x32xf32>
    %163 = arith.mulf %158, %162 : vector<2x1x32xf32>
    %164 = vector.shape_cast %143 : vector<32xf32> to vector<1x1x32xf32>
    %165 = vector.broadcast %164 : vector<1x1x32xf32> to vector<2x1x32xf32>
    %166 = arith.mulf %163, %165 : vector<2x1x32xf32>
    %167 = vector.shape_cast %145 : vector<32xf32> to vector<1x1x32xf32>
    %168 = vector.broadcast %167 : vector<1x1x32xf32> to vector<2x1x32xf32>
    %169 = arith.addf %166, %168 : vector<2x1x32xf32>
    %170 = vector.shape_cast %169 : vector<2x1x32xf32> to vector<2x32xf32>
    %171 = arith.truncf %170 : vector<2x32xf32> to vector<2x32xbf16>
    %c0_48 = arith.constant 0 : index
    %c0_49 = arith.constant 0 : index
    %172 = vector.load %arg10[%c0_48, %c0_49] : memref<32x128xbf16, #tpu.memory_space<vmem>>, vector<32x128xbf16>
    %cst_50 = arith.constant dense<0.000000e+00> : vector<2x128xf32>
    %173 = tpu.matmul %171, %172, %cst_50 {dimension_numbers = #tpu.dot_dimension_numbers<[1], [0], [0], [1], [0, 0, 1, 1], [], []>} : vector<2x32xbf16>, vector<32x128xbf16>, vector<2x128xf32> -> vector<2x128xf32>
    %c0_51 = arith.constant 0 : index
    %c0_52 = arith.constant 0 : index
    %174 = vector.load %arg11[%c0_51, %c0_52] : memref<1x128xf32, #tpu.memory_space<vmem>>, vector<1x128xf32>
    %175 = vector.broadcast %174 : vector<1x128xf32> to vector<2x128xf32>
    %176 = arith.addf %173, %175 : vector<2x128xf32>
    %cst_53 = arith.constant 5.000000e-01 : f32
    %177 = vector.broadcast %cst_53 : f32 to vector<2x128xf32>
    %178 = arith.mulf %177, %176 : vector<2x128xf32>
    %179 = arith.mulf %176, %176 : vector<2x128xf32>
    %180 = arith.mulf %179, %176 : vector<2x128xf32>
    %cst_54 = arith.constant 4.471500e-02 : f32
    %181 = vector.broadcast %cst_54 : f32 to vector<2x128xf32>
    %182 = arith.mulf %181, %180 : vector<2x128xf32>
    %183 = arith.addf %176, %182 : vector<2x128xf32>
    %cst_55 = arith.constant 0.797884583 : f32
    %184 = vector.broadcast %cst_55 : f32 to vector<2x128xf32>
    %185 = arith.mulf %184, %183 : vector<2x128xf32>
    %186 = math.tanh %185 : vector<2x128xf32>
    %cst_56 = arith.constant 1.000000e+00 : f32
    %187 = vector.broadcast %cst_56 : f32 to vector<2x128xf32>
    %188 = arith.addf %187, %186 : vector<2x128xf32>
    %189 = arith.mulf %178, %188 : vector<2x128xf32>
    %c0_57 = arith.constant 0 : index
    %c0_58 = arith.constant 0 : index
    %190 = vector.load %arg12[%c0_57, %c0_58] : memref<2x128xf32, #tpu.memory_space<vmem>>, vector<2x128xf32>
    tpu.vector_store %arg12[%c0_57, %c0_58], %189 {strides = array<i32>} : memref<2x128xf32, #tpu.memory_space<vmem>>, vector<2x128xf32>,
    return
  }
  func.func @transform_0(%arg0: i32) -> (i32, i32, i32) {
    %c0_i32 = arith.constant 0 : i32
    %c0_i32_0 = arith.constant 0 : i32
    %c0_i32_1 = arith.constant 0 : i32
    return %arg0, %c0_i32, %c0_i32_0 : i32, i32, i32
  }
  func.func @transform_1(%arg0: i32) -> (i32, i32, i32) {
    %c0_i32 = arith.constant 0 : i32
    %c0_i32_0 = arith.constant 0 : i32
    %c0_i32_1 = arith.constant 0 : i32
    return %arg0, %c0_i32, %c0_i32_0 : i32, i32, i32
  }
  func.func @transform_2(%arg0: i32) -> (i32, i32) {
    %c0_i32 = arith.constant 0 : i32
    %c0_i32_0 = arith.constant 0 : i32
    %c0_i32_1 = arith.constant 0 : i32
    return %c0_i32, %c0_i32_0 : i32, i32
  }
  func.func @transform_3(%arg0: i32) -> (i32, i32) {
    %c0_i32 = arith.constant 0 : i32
    %c0_i32_0 = arith.constant 0 : i32
    %c0_i32_1 = arith.constant 0 : i32
    return %c0_i32, %c0_i32_0 : i32, i32
  }
  func.func @transform_4(%arg0: i32) -> (i32, i32) {
    %c0_i32 = arith.constant 0 : i32
    %c0_i32_0 = arith.constant 0 : i32
    %c0_i32_1 = arith.constant 0 : i32
    return %c0_i32, %c0_i32_0 : i32, i32
  }
  func.func @transform_5(%arg0: i32) -> (i32, i32) {
    %c0_i32 = arith.constant 0 : i32
    %c0_i32_0 = arith.constant 0 : i32
    %c0_i32_1 = arith.constant 0 : i32
    return %c0_i32, %c0_i32_0 : i32, i32
  }
  func.func @transform_6(%arg0: i32) -> (i32, i32) {
    %c0_i32 = arith.constant 0 : i32
    %c0_i32_0 = arith.constant 0 : i32
    %c0_i32_1 = arith.constant 0 : i32
    return %c0_i32, %c0_i32_0 : i32, i32
  }
  func.func @transform_7(%arg0: i32) -> (i32, i32) {
    %c0_i32 = arith.constant 0 : i32
    %c0_i32_0 = arith.constant 0 : i32
    %c0_i32_1 = arith.constant 0 : i32
    return %c0_i32, %c0_i32_0 : i32, i32
  }
  func.func @transform_8(%arg0: i32) -> (i32, i32) {
    %c0_i32 = arith.constant 0 : i32
    %c0_i32_0 = arith.constant 0 : i32
    %c0_i32_1 = arith.constant 0 : i32
    return %c0_i32, %c0_i32_0 : i32, i32
  }
  func.func @transform_9(%arg0: i32) -> (i32, i32) {
    %c0_i32 = arith.constant 0 : i32
    %c0_i32_0 = arith.constant 0 : i32
    %c0_i32_1 = arith.constant 0 : i32
    return %c0_i32, %c0_i32_0 : i32, i32
  }
  func.func @transform_10(%arg0: i32) -> (i32, i32) {
    %c0_i32 = arith.constant 0 : i32
    %c0_i32_0 = arith.constant 0 : i32
    %c0_i32_1 = arith.constant 0 : i32
    return %c0_i32, %c0_i32_0 : i32, i32
  }
  func.func @transform_11(%arg0: i32) -> (i32, i32) {
    %c0_i32 = arith.constant 0 : i32
    %c0_i32_0 = arith.constant 0 : i32
    return %arg0, %c0_i32 : i32, i32
  }
}

</mosaic_0001>

<bundles_post_ra>
// kernel: tpu_custom_call.1
= control target key start
LH: loop header
LB: loop body
LE: loop exit
PB: predicated region body
PF: predicated region fallthrough
CT: control target
= control target key end

     0   :  { %16 = vsyncpa [#allocation3], 0  ;;  %s1648_s0 = inlined_call_operand.vmem [shape: f32[2,8,32], index: 0, kind: input, shape index: {}]   ;;  %s1649_s1 = inlined_call_operand.vmem [shape: f32[2,1,8], index: 1, kind: input, shape index: {}]   ;;  %s1650_s2 = inlined_call_operand.vmem [shape: f32[11,32], index: 2, kind: input, shape index: {}]   ;;  %s1651_s3 = inlined_call_operand.vmem [shape: bf16[32,32], index: 3, kind: input, shape index: {}]   ;;  %s1652_s4 = inlined_call_operand.vmem [shape: bf16[32,64], index: 4, kind: input, shape index: {}]   ;;  %s1653_s5 = inlined_call_operand.vmem [shape: bf16[32,32], index: 5, kind: input, shape index: {}]   ;;  %s1654_s6 = inlined_call_operand.hbm [shape: bf16[32,128], index: 6, kind: input, shape index: {}]   ;;  %s1655_s7 = inlined_call_operand.hbm [shape: f32[1,128], index: 7, kind: input, shape index: {}]   ;;  %s1656_s8 = inlined_call_operand.vmem [shape: bf16[128,32], index: 8, kind: input, shape index: {}]   ;;  %s1657_s9 = inlined_call_operand.vmem [shape: bf16[32,128], index: 9, kind: input, shape index: {}]   ;;  %s1658_s10 = inlined_call_operand.vmem [shape: f32[1,128], index: 10, kind: input, shape index: {}]   ;;  %s1659_s11 = inlined_call_operand.hbm [shape: f32[2,128], index: 11, kind: output, shape index: {}]  }
   0x1   :  { %17 = vsyncpa [#allocation6], 0 }
   0x2   :  { %18 = vsyncpa [#allocation4], 0  ;;  %s1333_s17 = smov [#allocation2]   ;;  %s1261_s21 = scalar_lea.hbm %s1654_s6, 256 }
   0x3   :  { %s36_s18 = sshll.u32 %s1333_s17, 4  ;;  %p1262_p0 = scmp.ne.s32.totalorder %s1654_s6, %s1261_s21  ;;  %s37_s18 = int_to_ptr.vmem [resolvable:$true] %s36_s18 }
   0x4   :  { %p1265_p1 = scmp.lt.u32.totalorder %s1261_s21, %s1654_s6 }
   0x6   :  { %p1267_p2 = pnand %p1265_p1, %p1262_p0 }
   0x8   :  { %1270 = shalt.err (!%p1267_p2)
}
   0x9   :  { %s1271_s26 = scalar_lea.vmem %s37_s18, 256  ;;  %p1276_p4 = scmp.lt.s32.totalorder %s37_s18, %s37_s18 }
   0xa   :  { %p1272_p3 = scmp.ne.s32.totalorder %s37_s18, %s1271_s26  ;;  %p1277_p5 = scmp.lt.s32.totalorder %s1271_s26, %s1271_s26 }
   0xc   :  { %p1278_p6 = por %p1277_p5, %p1276_p4 }
   0xe   :  { %p1279_p7 = pnand %p1278_p6, %p1272_p3 }
  0x10   :  { %1282 = shalt.err (!%p1279_p7)
}
  0x11   :  { %s1334_s27 = smov 64   ;;  %s1335_s28 = smov 4  }
  0x12   :  { %42 = dma.hbm_to_vmem [thread:$0]  %s1654_s6, 256, %s37_s18, [#allocation3], %s1334_s27, %s1334_s27, %s1335_s28  }
  0x13   :  { %s1336_s12 = smov [#allocation5]   ;;  %s1283_s16 = scalar_lea.hbm %s1655_s7, 16 }
  0x14   :  { %s49_s13 = sshll.u32 %s1336_s12, 4  ;;  %p1284_p8 = scmp.ne.s32.totalorder %s1655_s7, %s1283_s16  ;;  %s50_s13 = int_to_ptr.vmem [resolvable:$true] %s49_s13 }
  0x15   :  { %p1287_p9 = scmp.lt.u32.totalorder %s1283_s16, %s1655_s7 }
  0x17   :  { %p1289_p10 = pnand %p1287_p9, %p1284_p8 }
  0x19   :  { %1292 = shalt.err (!%p1289_p10)
}
  0x1a   :  { %s1293_s22 = scalar_lea.vmem %s50_s13, 16  ;;  %s1297_s6 = scalar_lea.vmem %s50_s13, 32 }
  0x1b   :  { %p1294_p11 = scmp.ne.s32.totalorder %s50_s13, %s1293_s22  ;;  %p1298_p12 = scmp.lt.s32.totalorder %s50_s13, %s50_s13 }
  0x1c   :  { %p1299_p13 = scmp.lt.s32.totalorder %s1297_s6, %s1293_s22 }
  0x1e   :  { %p1300_p0 = por %p1299_p13, %p1298_p12 }
  0x20   :  { %p1301_p1 = pnand %p1300_p0, %p1294_p11 }
  0x22   :  { %1304 = shalt.err (!%p1301_p1)
}
  0x23   :  { %52 = dma.hbm_to_vmem [thread:$0]  %s1655_s7, 16, %s50_s13, [#allocation6]  }
  0x24   :  { %1327 = dma.done.wait [#allocation3], 256  }
  0x25   :  { %1328 = vsyncadd [#allocation3], 4294967040 }
  0x26   :  { %1329 = dma.done.wait [#allocation6], 16  }
  0x27   :  { %1330 = vsyncadd [#allocation6], 4294967280  ;;  %vm72_vm0 = vcmask 261120   ;;  %v66_v0 = vld [vmem:[%s1648_s0] sm:$0xff]  ;;  %v67_v1 = vld [vmem:[%s1648_s0 + $0x8] sm:$0xff]  ;;  %v1337_v15 = vmov 0.0   ;;  %v100_v19 = vlaneseq }
  0x28   :  { %v73_v2 = vsel %vm72_vm0, %v66_v0, 0.0  ;;  %v76_v3 = vsel %vm72_vm0, %v67_v1, 0.0  ;;  %v1216_v14 = vld [vmem:[%s1652_s4] sm:$0xff]   ;;  %1122 = vmatprep.subr.bf16.mxu1 %v1337_v15  ;;  %1138 = vmatprep.subr.bf16.mxu0 %v1337_v15  ;;  %v1217_v16 = vld [vmem:[%s1652_s4 + $0x8] sm:$0xff]   ;;  %vm1338_vm1 = vmmov 0   ;;  %vm200_vm2 = vcmask 1041409  }
  0x29   :  { %74 = vadd.xlane.f32.xlu0 %v73_v2  ;;  %1123 = vmatpush3.bf16.msra.mxu1 %v1216_v14  ;;  %v1451_v23 = vshrl.u32 %v100_v19, 7  ;;  %v1457_v26 = vld [vmem:[%s1650_s2] sm:$0xff]  ;;  %v1219_v43 = vld [vmem:[%s1651_s3 + $0x8] sm:$0xff]   ;;  %v1339_v50 = vmov 1966171168   ;;  %vm388_vm3 = vcmask 57344  }
  0x2a   :  { %1126 = vmatprep.mubr.msk.bf16.mxu1 %vm1338_vm1, %v1337_v15  ;;  %1124 = vmatprep.subr.bf16.mxu1 %v1337_v15  ;;  %v1218_v38 = vld [vmem:[%s1651_s3] sm:$0xff]   ;;  %v265_v51 = vunpack.c.l.s4 %v1339_v50  ;;  %v216_v56 = vrot.slane %v1457_v26, 2  ;;  %v217_v57 = vrot.slane %v1457_v26, 1  ;;  %s1341_s20 = smov 96   ;;  %vm422_vm4 = vcmask 1043456  }
  0x2b   :  { %1140 = vmatprep.mubr.msk.bf16.mxu0 %vm1338_vm1, %v1337_v15  ;;  %v102_v25 = vsub.s32 0, %v1451_v23  ;;  %v108_v28 = vsub.s32 1, %v1451_v23  ;;  %v181_v48 = vsub.s32 3, %v1451_v23  ;;  %v68_v14 = vld [vmem:[%s1649_s1] sm:$0x1]  ;;  %vm418_vm5 = vcmask 64512  }
  0x2c   :  { %v266_v58 = vunpack.c.0.s8 %v265_v51  ;;  %vm614_vm6 = vcmask 253952  }
  0x2d   :  { %77 = vadd.xlane.f32.xlu0 %v76_v3  ;;  %1125 = vmatpush3.bf16.msra.mxu1 %v1217_v16  ;;  %v103_v27 = vrot.slane %v1457_v26, %v102_v25  ;;  %v109_v32 = vrot.slane %v1457_v26, %v108_v28  ;;  %v182_v49 = vrot.slane %v1457_v26, %v181_v48  ;;  %v69_v16 = vld [vmem:[%s1649_s1 + $0x1] sm:$0x1]  ;;  %s1340_s1 = smov 32  }
  0x2e   :  { %1130 = vmatprep.subr.bf16.mxu1 %v1337_v15 }
  0xb6   :  { %v75_v4 = vpop.xlane.xlu0 %74 }
  0xb7   :  { %v80_v5 = vmul.f32 0.03125, %v75_v4 }
  0xb9   :  { %v82_v6 = vsub.f32 %v66_v0, %v80_v5  ;;  %v218_v0 = vsel %vm200_vm2, %v217_v57, %v216_v56 }
  0xba   :  { %v78_v7 = vpop.xlane.xlu0 %77 }
  0xbb   :  { %v81_v8 = vmul.f32 0.03125, %v78_v7  ;;  %v84_v9 = vmul.f32 %v82_v6, %v82_v6 }
  0xbd   :  { %v83_v10 = vsub.f32 %v67_v1, %v81_v8  ;;  %v86_v11 = vsel %vm72_vm0, %v84_v9, 0.0  ;;  %v1500_v1 = vsub.s32 %v266_v58, %v1451_v23 }
  0xbe   :  { %87 = vadd.xlane.f32.xlu1 %v86_v11 }
  0xbf   :  { %v85_v12 = vmul.f32 %v83_v10, %v83_v10 }
  0xc1   :  { %v89_v13 = vsel %vm72_vm0, %v85_v12, 0.0 }
  0xc2   :  { %90 = vadd.xlane.f32.xlu1 %v89_v13 }
 0x14b   :  { %v88_v17 = vpop.xlane.xlu1 %87 }
 0x14c   :  { %v92_v18 = vmul.f32 0.03125, %v88_v17  ;;  %v1065_v17 = vadd.f32 -1.0, %v68_v14 }
 0x14e   :  { %v94_v20 = vadd.f32 1e-12, %v92_v18  ;;  %v1066_v18 = vadd.f32 -1.0, %v69_v16  ;;  %v294_v19 = vmul.f32 1e+09, %v1065_v17 }
 0x14f   :  { %v91_v21 = vpop.xlane.xlu1 %90 }
 0x150   :  { %1235 = vrsqrt.f32 %v94_v20  ;;  %v93_v22 = vmul.f32 0.03125, %v91_v21  ;;  %v295_v20 = vmul.f32 1e+09, %v1066_v18 }
 0x152   :  { %v95_v24 = vadd.f32 1e-12, %v93_v22 }
 0x154   :  { %1237 = vrsqrt.f32 %v95_v24 }
 0x15a   :  { %v1236_v29 = vpop.eup %1235 }
 0x15b   :  { %v98_v30 = vmul.f32 %v1236_v29, %v82_v6 }
 0x15d   :  { %v104_v31 = vmul.f32 %v103_v27, %v98_v30 }
 0x15e   :  { %v1238_v33 = vpop.eup %1237 }
 0x15f   :  { %v99_v34 = vmul.f32 %v1238_v33, %v83_v10  ;;  %v1462_v36 = vadd.f32 %v109_v32, %v104_v31 }
 0x161   :  { %v105_v35 = vmul.f32 %v103_v27, %v99_v34  ;;  %v112_v39 = vpack.c.bf16 %v1462_v36, %v1462_v36 }
 0x163   :  { %v1464_v37 = vadd.f32 %v109_v32, %v105_v35  ;;  %v120_v44 = vunpack.c.l.b16 %v112_v39  ;;  %v187_v35 = vsub.s32 4, %v1451_v23 }
 0x165   :  { %v113_v40 = vpack.c.bf16 %v1464_v37, %v1464_v37  ;;  %v1089_v41 = vpack.c.bf16 %v1464_v37, %v1462_v36 }
 0x167   :  { %v121_v42 = vunpack.c.l.b16 %v113_v40  ;;  %1127 = vmatmul.mubr.msk.bf16.vlgmr.msra.gmra.mrb[0].mxu1 %vm72_vm0, %v1089_v41 }
 0x168   :  { %1131 = vmatpush3.bf16.msra.mxu1 %v1218_v38  ;;  %1134 = vmatprep.mubr.msk.bf16.mxu1 %vm1338_vm1, %v1337_v15  ;;  %v188_v38 = vrot.slane %v1457_v26, %v187_v35 }
 0x169   :  { %1132 = vmatprep.subr.bf16.mxu1 %v1337_v15  ;;  %v199_v45 = vrot.slane %v121_v42, 7 }
 0x16b   :  { %v201_v46 = vsel %vm200_vm2, %v199_v45, %v120_v44 }
 0x16c   :  { %1133 = vmatpush3.bf16.msra.mxu1 %v1219_v43  ;;  %v202_v47 = vpack.c.b16 %v201_v46, %v201_v46 }
 0x16d   :  { %1144 = vmatprep.subr.bf16.mxu1 %v1337_v15 }
 0x16f   :  { %1135 = vmatmul.mubr.msk.bf16.vlgmr.msra.gmra.mrb[4].mxu1 %vm72_vm0, %v202_v47 }
 0x170   :  { %1146 = vmatprep.mubr.msk.bf16.mxu1 %vm1338_vm1, %v1337_v15 }
 0x23a   :  { %v1489_v52 = vpop.f32.mrb[0].mxu1 }
 0x23b   :  { %v183_v53 = vadd.f32 %v182_v49, %v1489_v52  ;;  %v1128_v54 = vpop.f32.mrb[1].mxu1 }
 0x23c   :  { %v1492_v55 = vpop.f32.mrb[2].mxu1 }
 0x23d   :  { %v290_v59 = vpack.c.bf16 %v183_v53, %v183_v53  ;;  %v184_v60 = vadd.f32 %v182_v49, %v1492_v55  ;;  %v1129_v61 = vpop.f32.mrb[3].mxu1 }
 0x23f   :  { %v291_v62 = vpack.c.bf16 %v184_v60, %v184_v60  ;;  %v300_v63 = vsel %vm72_vm0, %v290_v59, 0 }
 0x240   :  { %1139 = vmatpush3.bf16.xpose.msra.mxu0 %v300_v63 }
 0x241   :  { %v346_v2 = vsel %vm72_vm0, %v291_v62, 0  ;;  %1150 = vmatprep.subr.bf16.mxu0 %v1337_v15 }
 0x242   :  { %v257_v3 = vpop.f32.mrb[4].mxu1  ;;  %1145 = vmatpush3.bf16.xpose.msra.mxu1 %v346_v2  ;;  %v1220_v2 = vld [vmem:[%s1653_s5] sm:$0xff]  }
 0x243   :  { %v258_v4 = vadd.f32 %v257_v3, %v218_v0  ;;  %v1136_v5 = vpop.f32.mrb[5].mxu1  ;;  %1156 = vmatprep.subr.bf16.mxu1 %v1337_v15  ;;  %v1221_v3 = vld [vmem:[%s1653_s5 + $0x8] sm:$0xff]  }
 0x244   :  { %v260_v6 = vpop.f32.mrb[6].mxu1 }
 0x245   :  { %v270_v7 = vrot.slane %v258_v4, %v1500_v1  ;;  %v1137_v8 = vpop.f32.mrb[7].mxu1 }
 0x247   :  { %v271_v9 = vcombine.high %v270_v7, %v270_v7  ;;  %v278_v10 = vrot.slane %v270_v7, %v1500_v1 }
 0x249   :  { %v285_v11 = vrot.slane %v271_v9, %v1500_v1  ;;  %v288_v12 = vpack.c.bf16 %v278_v10, %v278_v10 }
 0x24b   :  { %v289_v13 = vpack.c.bf16 %v285_v11, %v285_v11  ;;  %1141 = vmatmul.mubr.msk.bf16.vlgmr.msra.gmra.mrb[0].mxu0 %vm72_vm0, %v288_v12 }
 0x24c   :  { %1152 = vmatprep.mubr.msk.bf16.mxu0 %vm1338_vm1, %v1337_v15 }
 0x24d   :  { %1147 = vmatmul.mubr.msk.bf16.vlgmr.msra.gmra.mrb[8].mxu1 %vm72_vm0, %v289_v13 }
 0x24e   :  { %1158 = vmatprep.mubr.msk.bf16.mxu1 %vm1338_vm1, %v1337_v15 }
 0x31e   :  { %v336_v21 = vpop.f32.mrb[0].mxu0 }
 0x31f   :  { %v337_v22 = vadd.f32 %v336_v21, %v294_v19  ;;  %v1142_v24 = vpop.f32.mrb[1].mxu0  ;;  %v541_v21 = vrot.slane %v1457_v26, 4 }
 0x320   :  { %v339_v25 = vpop.f32.mrb[2].mxu0  ;;  %v382_v27 = vpop.f32.mrb[8].mxu1 }
 0x321   :  { %v383_v28 = vadd.f32 %v382_v27, %v295_v20  ;;  %v1143_v29 = vpop.f32.mrb[3].mxu0  ;;  %v1148_v30 = vpop.f32.mrb[9].mxu1  ;;  %v389_v31 = vsel %vm388_vm3, %v337_v22, -inf  ;;  %v540_v20 = vrot.slane %v1457_v26, 5 }
 0x322   :  { %390 = vmax.xlane.f32.xlu1 %v389_v31  ;;  %v385_v32 = vpop.f32.mrb[10].mxu1 }
 0x323   :  { %v1149_v33 = vpop.f32.mrb[11].mxu1  ;;  %v392_v34 = vsel %vm388_vm3, %v383_v28, -inf }
 0x324   :  { %393 = vmax.xlane.f32.xlu0 %v392_v34 }
 0x33a   :  { %190 = vrot.lane.b32.xlu0 %v188_v38, %s1340_s1 }
 0x3af   :  { %v391_v39 = vpop.xlane.xlu1 %390 }
 0x3b0   :  { %v395_v40 = vsub.f32 %v337_v22, %v391_v39  ;;  %v542_v22 = vsel %vm200_vm2, %v541_v21, %v540_v20 }
 0x3b1   :  { %v394_v41 = vpop.xlane.xlu0 %393 }
 0x3b2   :  { %v397_v42 = vmul.f32 1.442695, %v395_v40  ;;  %v396_v43 = vsub.f32 %v383_v28, %v394_v41 }
 0x3b4   :  { %1239 = vpow2.f32 %v397_v42  ;;  %v399_v44 = vmul.f32 1.442695, %v396_v43 }
 0x3b5   :  { %v191_v45 = vpop.permute.xlu0 %190 }
 0x3b6   :  { %1241 = vpow2.f32 %v399_v44  ;;  %v193_v46 = vadd.f32 %v191_v45, %v1489_v52  ;;  %v194_v51 = vadd.f32 %v191_v45, %v1492_v55 }
 0x3b8   :  { %v413_v47 = vpack.c.bf16 %v193_v46, %v193_v46  ;;  %v414_v53 = vpack.c.bf16 %v194_v51, %v194_v51 }
 0x3ba   :  { %416 = vrot.lane.b32.xlu0 %v413_v47, %s1341_s20 }
 0x3be   :  { %v1240_v48 = vpop.eup %1239 }
 0x3bf   :  { %v401_v23 = vsel %vm388_vm3, %v1240_v48, 0.0 }
 0x3c0   :  { %v1242_v49 = vpop.eup %1241  ;;  %402 = vadd.xlane.f32.xlu1 %v401_v23  ;;  %v1222_v23 = vld [vmem:[#allocation2] sm:$0xff]  }
 0x3c1   :  { %v404_v50 = vsel %vm388_vm3, %v1242_v49, 0.0 }
 0x3c4   :  { %405 = vadd.xlane.f32.xlu1 %v404_v50 }
 0x3d5   :  { %467 = vrot.lane.b32.xlu1 %v414_v53, %s1341_s20  ;;  %s1342_s20 = smov [#allocation7]  }
 0x3d6   :  { %s1048_s21 = sshll.u32 %s1342_s20, 4  ;;  %s1049_s21 = int_to_ptr.vmem [resolvable:$true] %s1048_s21 }
 0x3d7   :  { %p1310_p3 = scmp.lt.s32.totalorder %s1049_s21, %s1049_s21 }
 0x42c   :  { %v417_v54 = vpop.permute.xlu0 %416 }
 0x42d   :  { %v424_v56 = vsel %vm422_vm4, %v417_v54, 0 }
 0x42e   :  { %1151 = vmatpush3.bf16.msra.mxu0 %v424_v56 }
 0x42f   :  { %1162 = vmatprep.subr.bf16.mxu0 %v1337_v15 }
 0x44d   :  { %v403_v52 = vpop.xlane.xlu1 %402 }
 0x44e   :  { %1243 = vrcp.f32 %v403_v52  ;;  %v641_v52 = vrot.slane %v1457_v26, 6 }
 0x451   :  { %v406_v57 = vpop.xlane.xlu1 %405 }
 0x452   :  { %1245 = vrcp.f32 %v406_v57 }
 0x455   :  { %v468_v58 = vpop.permute.xlu1 %467 }
 0x456   :  { %v473_v59 = vsel %vm422_vm4, %v468_v58, 0  ;;  %v645_v58 = vrot.slane %v1457_v26, 7 }
 0x457   :  { %1157 = vmatpush3.bf16.msra.mxu1 %v473_v59 }
 0x458   :  { %v1244_v60 = vpop.eup %1243  ;;  %1170 = vmatprep.subr.bf16.mxu1 %v1337_v15 }
 0x459   :  { %v409_v61 = vmul.f32 %v1244_v60, %v1240_v48 }
 0x45b   :  { %v411_v55 = vpack.c.bf16 %v409_v61, %v409_v61 }
 0x45c   :  { %v1246_v62 = vpop.eup %1245 }
 0x45d   :  { %v410_v63 = vmul.f32 %v1246_v62, %v1242_v49  ;;  %1153 = vmatmul.mubr.msk.bf16.vlgmr.msra.gmra.mrb[4].mxu0 %vm418_vm5, %v411_v55 }
 0x45e   :  { %1166 = vmatprep.mubr.msk.bf16.mxu0 %vm1338_vm1, %v1337_v15  ;;  %1163 = vmatpush3.bf16.msra.mxu0 %v1220_v2 }
 0x45f   :  { %v412_v0 = vpack.c.bf16 %v410_v63, %v410_v63  ;;  %1164 = vmatprep.subr.bf16.mxu0 %v1337_v15 }
 0x461   :  { %1159 = vmatmul.mubr.msk.bf16.vlgmr.msra.gmra.mrb[12].mxu1 %vm418_vm5, %v412_v0 }
 0x462   :  { %1174 = vmatprep.mubr.msk.bf16.mxu1 %vm1338_vm1, %v1337_v15  ;;  %1165 = vmatpush3.bf16.msra.mxu0 %v1221_v3 }
 0x463   :  { %1178 = vmatprep.subr.bf16.mxu0 %v1337_v15  ;;  %1171 = vmatpush3.bf16.msra.mxu1 %v1222_v23 }
 0x464   :  { %1172 = vmatprep.subr.bf16.mxu1 %v1337_v15 }
 0x530   :  { %v460_v4 = vpop.f32.mrb[4].mxu0 }
 0x531   :  { %v1154_v5 = vpop.f32.mrb[5].mxu0  ;;  %v515_v9 = vpack.c.bf16 %v460_v4, %v460_v4 }
 0x532   :  { %v463_v6 = vpop.f32.mrb[6].mxu0 }
 0x533   :  { %v1155_v7 = vpop.f32.mrb[7].mxu0  ;;  %v523_v16 = vunpack.c.l.b16 %v515_v9  ;;  %v1226_v9 = vld [vmem:[%s1656_s8 + $0x8] sm:$0xff]  }
 0x534   :  { %v509_v8 = vpop.f32.mrb[12].mxu1 }
 0x535   :  { %v516_v10 = vpack.c.bf16 %v509_v8, %v509_v8  ;;  %v1160_v11 = vpop.f32.mrb[13].mxu1  ;;  %v1225_v8 = vld [vmem:[%s1656_s8] sm:$0xff]  }
 0x536   :  { %v512_v12 = vpop.f32.mrb[14].mxu1  ;;  %v1228_v11 = vld [vmem:[%s1656_s8 + $0x18] sm:$0xff]  }
 0x537   :  { %v524_v13 = vunpack.c.l.b16 %v516_v10  ;;  %v1161_v14 = vpop.f32.mrb[15].mxu1  ;;  %v1227_v10 = vld [vmem:[%s1656_s8 + $0x10] sm:$0xff]   ;;  %v1229_v12 = vld [vmem:[%s1656_s8 + $0x20] sm:$0xff]  }
 0x538   :  { %v1231_v14 = vld [vmem:[%s1656_s8 + $0x30] sm:$0xff]  }
 0x539   :  { %v525_v17 = vrot.slane %v524_v13, 7  ;;  %v1230_v13 = vld [vmem:[%s1656_s8 + $0x28] sm:$0xff]  }
 0x53b   :  { %v526_v18 = vsel %vm200_vm2, %v525_v17, %v523_v16  ;;  %v1232_v16 = vld [vmem:[%s1656_s8 + $0x38] sm:$0xff]   ;;  %v1224_v17 = vld [vmem:[#allocation5] ss:$0 sps:$4 sm:$0x11]  }
 0x53c   :  { %v527_v19 = vpack.c.b16 %v526_v18, %v526_v18  ;;  %v683_v18 = vrot.slane %v1224_v17, %v1500_v1 }
 0x53e   :  { %1167 = vmatmul.mubr.msk.bf16.vlgmr.msra.gmra.mrb[8].mxu0 %vm72_vm0, %v527_v19  ;;  %v690_v19 = vrot.slane %v683_v18, %v1500_v1  ;;  %v1234_v18 = vld [vmem:[%s1657_s9 + $0x8] sm:$0xff]  }
 0x53f   :  { %1194 = vmatprep.mubr.msk.bf16.mxu0 %vm1338_vm1, %v1337_v15  ;;  %1179 = vmatpush3.bf16.msra.mxu0 %v1225_v8 }
 0x540   :  { %1180 = vmatprep.subr.bf16.mxu0 %v1337_v15 }
 0x543   :  { %1181 = vmatpush3.bf16.msra.mxu0 %v1226_v9 }
 0x544   :  { %1182 = vmatprep.subr.bf16.mxu0 %v1337_v15 }
 0x547   :  { %1183 = vmatpush3.bf16.msra.mxu0 %v1227_v10 }
 0x548   :  { %1184 = vmatprep.subr.bf16.mxu0 %v1337_v15 }
 0x54b   :  { %1185 = vmatpush3.bf16.msra.mxu0 %v1228_v11 }
 0x54c   :  { %1186 = vmatprep.subr.bf16.mxu0 %v1337_v15 }
 0x54f   :  { %1187 = vmatpush3.bf16.msra.mxu0 %v1229_v12 }
 0x550   :  { %1188 = vmatprep.subr.bf16.mxu0 %v1337_v15 }
 0x553   :  { %1189 = vmatpush3.bf16.msra.mxu0 %v1230_v13 }
 0x554   :  { %1190 = vmatprep.subr.bf16.mxu0 %v1337_v15 }
 0x557   :  { %1191 = vmatpush3.bf16.msra.mxu0 %v1231_v14 }
 0x558   :  { %1192 = vmatprep.subr.bf16.mxu0 %v1337_v15 }
 0x55b   :  { %1193 = vmatpush3.bf16.msra.mxu0 %v1232_v16 }
 0x611   :  { %v581_v24 = vpop.f32.mrb[8].mxu0 }
 0x612   :  { %v582_v25 = vadd.f32 %v581_v24, %v542_v22  ;;  %v1168_v27 = vpop.f32.mrb[9].mxu0 }
 0x613   :  { %v584_v28 = vpop.f32.mrb[10].mxu0 }
 0x614   :  { %v594_v29 = vrot.slane %v582_v25, %v1500_v1  ;;  %v1169_v30 = vpop.f32.mrb[11].mxu0 }
 0x616   :  { %v595_v31 = vcombine.high %v594_v29, %v594_v29  ;;  %v602_v32 = vrot.slane %v594_v29, %v1500_v1 }
 0x618   :  { %v612_v33 = vadd.f32 %v602_v32, %v1462_v36  ;;  %v609_v34 = vrot.slane %v595_v31, %v1500_v1 }
 0x61a   :  { %v615_v35 = vsel %vm614_vm6, %v612_v33, 0.0  ;;  %v613_v38 = vadd.f32 %v609_v34, %v1464_v37  ;;  %v1223_v37 = vld [vmem:[#allocation2 + $0x8] sm:$0xff]  }
 0x61b   :  { %616 = vadd.xlane.f32.xlu0 %v615_v35  ;;  %1173 = vmatpush3.bf16.msra.mxu1 %v1223_v37 }
 0x61c   :  { %v618_v39 = vsel %vm614_vm6, %v613_v38, 0.0  ;;  %1198 = vmatprep.subr.bf16.mxu1 %v1337_v15 }
 0x61d   :  { %619 = vadd.xlane.f32.xlu1 %v618_v39 }
 0x6a8   :  { %v617_v40 = vpop.xlane.xlu0 %616 }
 0x6a9   :  { %v621_v41 = vmul.f32 0.03125, %v617_v40 }
 0x6aa   :  { %v620_v42 = vpop.xlane.xlu1 %619 }
 0x6ab   :  { %v622_v43 = vmul.f32 0.03125, %v620_v42  ;;  %v623_v44 = vsub.f32 %v612_v33, %v621_v41 }
 0x6ad   :  { %v624_v45 = vsub.f32 %v613_v38, %v622_v43  ;;  %v625_v36 = vmul.f32 %v623_v44, %v623_v44 }
 0x6af   :  { %v626_v46 = vmul.f32 %v624_v45, %v624_v45  ;;  %v627_v48 = vsel %vm614_vm6, %v625_v36, 0.0 }
 0x6b1   :  { %v630_v47 = vsel %vm614_vm6, %v626_v46, 0.0 }
 0x6b2   :  { %631 = vadd.xlane.f32.xlu0 %v630_v47 }
 0x6b6   :  { %628 = vadd.xlane.f32.xlu0 %v627_v48 }
 0x73f   :  { %v632_v49 = vpop.xlane.xlu0 %631 }
 0x740   :  { %v634_v50 = vmul.f32 0.03125, %v632_v49 }
 0x742   :  { %v636_v51 = vadd.f32 1e-12, %v634_v50 }
 0x743   :  { %v629_v53 = vpop.xlane.xlu0 %628 }
 0x744   :  { %1247 = vrsqrt.f32 %v636_v51  ;;  %v633_v54 = vmul.f32 0.03125, %v629_v53 }
 0x746   :  { %v635_v56 = vadd.f32 1e-12, %v633_v54 }
 0x748   :  { %1249 = vrsqrt.f32 %v635_v56 }
 0x74e   :  { %v1248_v57 = vpop.eup %1247 }
 0x74f   :  { %v640_v59 = vmul.f32 %v1248_v57, %v624_v45 }
 0x751   :  { %v644_v60 = vmul.f32 %v641_v52, %v640_v59 }
 0x752   :  { %v1250_v61 = vpop.eup %1249 }
 0x753   :  { %v1562_v55 = vadd.f32 %v645_v58, %v644_v60  ;;  %v639_v62 = vmul.f32 %v1250_v61, %v623_v44 }
 0x755   :  { %v643_v63 = vmul.f32 %v641_v52, %v639_v62  ;;  %v650_v0 = vpack.c.bf16 %v1562_v55, %v1562_v55  ;;  %v71_v52 = vld [vmem:[%s1650_s2 + $0x8] sm:$0x7] }
 0x756   :  { %v853_v57 = vrot.slane %v71_v52, 7 }
 0x757   :  { %v1566_v2 = vadd.f32 %v645_v58, %v643_v63  ;;  %v659_v3 = vunpack.c.l.b16 %v650_v0 }
 0x758   :  { %v854_v58 = vsel %vm200_vm2, %v853_v57, %v71_v52 }
 0x759   :  { %v649_v4 = vpack.c.bf16 %v1566_v2, %v1566_v2  ;;  %v660_v6 = vrot.slane %v659_v3, 7 }
 0x75b   :  { %v658_v5 = vunpack.c.l.b16 %v649_v4 }
 0x75d   :  { %v661_v26 = vsel %vm200_vm2, %v660_v6, %v658_v5 }
 0x75e   :  { %v662_v7 = vpack.c.b16 %v661_v26, %v661_v26 }
 0x760   :  { %1175 = vmatmul.mubr.msk.bf16.vlgmr.msra.gmra.mrb[16].mxu1 %vm72_vm0, %v662_v7 }
 0x761   :  { %1202 = vmatprep.mubr.msk.bf16.mxu1 %vm1338_vm1, %v1337_v15 }
 0x833   :  { %v729_v20 = vpop.f32.mrb[16].mxu1 }
 0x834   :  { %v730_v21 = vadd.f32 %v729_v20, %v690_v19  ;;  %v1176_v22 = vpop.f32.mrb[17].mxu1 }
 0x835   :  { %v732_v24 = vpop.f32.mrb[18].mxu1 }
 0x836   :  { %v742_v25 = vrot.slane %v730_v21, %v1500_v1  ;;  %v1177_v27 = vpop.f32.mrb[19].mxu1 }
 0x837   :  { %v949_v27 = vrot.slane %v71_v52, 1 }
 0x838   :  { %v743_v28 = vcombine.high %v742_v25, %v742_v25  ;;  %v750_v29 = vrot.slane %v742_v25, %v1500_v1 }
 0x83a   :  { %v757_v30 = vrot.slane %v743_v28, %v1500_v1  ;;  %v762_v31 = vmul.f32 %v750_v29, %v750_v29  ;;  %v760_v44 = vmul.f32 0.5, %v750_v29 }
 0x83c   :  { %v763_v32 = vmul.f32 %v757_v30, %v757_v30  ;;  %v764_v33 = vmul.f32 %v762_v31, %v750_v29  ;;  %v761_v47 = vmul.f32 0.5, %v757_v30 }
 0x83e   :  { %v765_v34 = vmul.f32 %v763_v32, %v757_v30  ;;  %v766_v35 = vmul.f32 0.044715, %v764_v33 }
 0x840   :  { %v767_v38 = vmul.f32 0.044715, %v765_v34  ;;  %v768_v39 = vadd.f32 %v766_v35, %v750_v29  ;;  %v953_v29 = vrot.slane %v71_v52, 2 }
 0x842   :  { %v769_v40 = vadd.f32 %v767_v38, %v757_v30  ;;  %v770_v41 = vmul.f32 0.7978846, %v768_v39 }
 0x844   :  { %v771_v42 = vmul.f32 0.7978846, %v769_v40  ;;  %1251 = vtanh.f32 %v770_v41 }
 0x846   :  { %1253 = vtanh.f32 %v771_v42 }
 0x84e   :  { %v1252_v43 = vpop.eup %1251 }
 0x84f   :  { %v774_v45 = vadd.f32 1.0, %v1252_v43 }
 0x850   :  { %v1254_v46 = vpop.eup %1253 }
 0x851   :  { %v775_v36 = vadd.f32 1.0, %v1254_v46  ;;  %v776_v48 = vmul.f32 %v774_v45, %v760_v44  ;;  %v1085_v45 = vld [vmem:[%s1658_s10] ss:$0 sm:$0xff]  ;;  %s1305_s10 = scalar_lea.vmem %s1049_s21, 32 }
 0x852   :  { %p1306_p2 = scmp.ne.s32.totalorder %s1049_s21, %s1305_s10  ;;  %p1311_p4 = scmp.lt.s32.totalorder %s1305_s10, %s1305_s10 }
 0x853   :  { %v777_v23 = vmul.f32 %v775_v36, %v761_v47  ;;  %v778_v37 = vpack.c.bf16 %v776_v48, %v776_v48 }
 0x854   :  { %p1312_p5 = por %p1311_p4, %p1310_p3 }
 0x855   :  { %v779_v49 = vpack.c.bf16 %v777_v23, %v777_v23  ;;  %v798_v51 = vunpack.c.l.b16 %v778_v37 }
 0x856   :  { %p1313_p6 = pnand %p1312_p5, %p1306_p2 }
 0x857   :  { %v799_v50 = vunpack.c.l.b16 %v779_v49 }
 0x859   :  { %v800_v53 = vrot.slane %v799_v50, 7 }
 0x85b   :  { %v801_v54 = vsel %vm200_vm2, %v800_v53, %v798_v51 }
 0x85c   :  { %v802_v56 = vpack.c.b16 %v801_v54, %v801_v54 }
 0x85e   :  { %1195 = vmatmul.mubr.bf16.vlgmr.msra.gmra.mrb[12].mxu0 %v802_v56 }
 0x931   :  { %v890_v59 = vpop.f32.mrb[12].mxu0 }
 0x932   :  { %v891_v60 = vadd.f32 %v890_v59, %v854_v58  ;;  %v1196_v61 = vpop.f32.mrb[13].mxu0 }
 0x933   :  { %v893_v62 = vpop.f32.mrb[14].mxu0 }
 0x934   :  { %v903_v63 = vrot.slane %v891_v60, %v1500_v1  ;;  %v1197_v0 = vpop.f32.mrb[15].mxu0 }
 0x936   :  { %v904_v3 = vcombine.high %v903_v63, %v903_v63  ;;  %v911_v4 = vrot.slane %v903_v63, %v1500_v1 }
 0x938   :  { %v921_v5 = vadd.f32 %v911_v4, %v1566_v2  ;;  %v918_v6 = vrot.slane %v904_v3, %v1500_v1 }
 0x93a   :  { %v923_v26 = vsel %vm614_vm6, %v921_v5, 0.0  ;;  %v922_v7 = vadd.f32 %v918_v6, %v1562_v55  ;;  %v1233_v55 = vld [vmem:[%s1657_s9] sm:$0xff]  }
 0x93b   :  { %924 = vadd.xlane.f32.xlu0 %v923_v26  ;;  %1199 = vmatpush3.bf16.msra.mxu1 %v1233_v55 }
 0x93c   :  { %v926_v8 = vsel %vm614_vm6, %v922_v7, 0.0  ;;  %1200 = vmatprep.subr.bf16.mxu1 %v1337_v15 }
 0x93d   :  { %927 = vadd.xlane.f32.xlu1 %v926_v8 }
 0x93f   :  { %1201 = vmatpush3.bf16.msra.mxu1 %v1234_v18 }
 0x9c8   :  { %v925_v9 = vpop.xlane.xlu0 %924 }
 0x9c9   :  { %v929_v10 = vmul.f32 0.03125, %v925_v9 }
 0x9ca   :  { %v928_v11 = vpop.xlane.xlu1 %927 }
 0x9cb   :  { %v931_v12 = vsub.f32 %v921_v5, %v929_v10  ;;  %v930_v13 = vmul.f32 0.03125, %v928_v11 }
 0x9cd   :  { %v932_v14 = vsub.f32 %v922_v7, %v930_v13  ;;  %v933_v16 = vmul.f32 %v931_v12, %v931_v12 }
 0x9cf   :  { %v935_v17 = vsel %vm614_vm6, %v933_v16, 0.0  ;;  %v934_v2 = vmul.f32 %v932_v14, %v932_v14 }
 0x9d0   :  { %936 = vadd.xlane.f32.xlu0 %v935_v17 }
 0x9d1   :  { %v938_v1 = vsel %vm614_vm6, %v934_v2, 0.0 }
 0x9d2   :  { %939 = vadd.xlane.f32.xlu1 %v938_v1 }
 0xa5d   :  { %v937_v19 = vpop.xlane.xlu0 %936 }
 0xa5e   :  { %v941_v20 = vmul.f32 0.03125, %v937_v19 }
 0xa5f   :  { %v940_v21 = vpop.xlane.xlu1 %939 }
 0xa60   :  { %v943_v22 = vadd.f32 1e-12, %v941_v20  ;;  %v942_v24 = vmul.f32 0.03125, %v940_v21 }
 0xa62   :  { %1255 = vrsqrt.f32 %v943_v22  ;;  %v944_v25 = vadd.f32 1e-12, %v942_v24 }
 0xa64   :  { %1257 = vrsqrt.f32 %v944_v25 }
 0xa6c   :  { %v1256_v28 = vpop.eup %1255 }
 0xa6d   :  { %v947_v30 = vmul.f32 %v1256_v28, %v931_v12 }
 0xa6e   :  { %v1258_v31 = vpop.eup %1257 }
 0xa6f   :  { %v951_v32 = vmul.f32 %v949_v27, %v947_v30  ;;  %v948_v33 = vmul.f32 %v1258_v31, %v932_v14 }
 0xa71   :  { %v955_v34 = vadd.f32 %v953_v29, %v951_v32  ;;  %v952_v35 = vmul.f32 %v949_v27, %v948_v33 }
 0xa73   :  { %v956_v38 = vadd.f32 %v953_v29, %v952_v35  ;;  %v957_v15 = vpack.c.bf16 %v955_v34, %v955_v34 }
 0xa75   :  { %v958_v39 = vpack.c.bf16 %v956_v38, %v956_v38  ;;  %v972_v41 = vunpack.c.l.b16 %v957_v15 }
 0xa77   :  { %v973_v40 = vunpack.c.l.b16 %v958_v39 }
 0xa79   :  { %v974_v42 = vrot.slane %v973_v40, 7 }
 0xa7b   :  { %v975_v43 = vsel %vm200_vm2, %v974_v42, %v972_v41 }
 0xa7c   :  { %v976_v44 = vpack.c.b16 %v975_v43, %v975_v43 }
 0xa7e   :  { %1203 = vmatmul.mubr.msk.bf16.vlgmr.msra.gmra.mrb[20].mxu1 %vm72_vm0, %v976_v44 }
 0xb51   :  { %v1026_v46 = vpop.f32.mrb[20].mxu1 }
 0xb52   :  { %v1027_v47 = vadd.f32 %v1085_v45, %v1026_v46  ;;  %v1204_v36 = vpop.f32.mrb[21].mxu1 }
 0xb53   :  { %v1029_v48 = vpop.f32.mrb[22].mxu1 }
 0xb54   :  { %v1033_v23 = vmul.f32 %v1027_v47, %v1027_v47  ;;  %v1205_v37 = vpop.f32.mrb[23].mxu1  ;;  %v1032_v56 = vmul.f32 0.5, %v1027_v47 }
 0xb56   :  { %v1034_v49 = vmul.f32 %v1033_v23, %v1027_v47 }
 0xb58   :  { %v1035_v50 = vmul.f32 0.044715, %v1034_v49 }
 0xb5a   :  { %v1036_v51 = vadd.f32 %v1035_v50, %v1027_v47 }
 0xb5c   :  { %v1037_v53 = vmul.f32 0.7978846, %v1036_v51 }
 0xb5e   :  { %1259 = vtanh.f32 %v1037_v53 }
 0xb68   :  { %v1260_v54 = vpop.eup %1259 }
 0xb69   :  { %v1039_v52 = vadd.f32 1.0, %v1260_v54 }
 0xb6b   :  { %v1040_v57 = vmul.f32 %v1039_v52, %v1032_v56 }
 0xb6d   :  { %1041 = vst [vmem:[#allocation7] sm:$0x3] %v1040_v57 }
 0xb6e   :  { %1316 = shalt.err (!%p1313_p6)
}
 0xb6f   :  { %s1317_s18 = scalar_lea.hbm %s1659_s11, 32 }
 0xb70   :  { %p1318_p7 = scmp.ne.s32.totalorder %s1659_s11, %s1317_s18  ;;  %p1321_p8 = scmp.lt.u32.totalorder %s1317_s18, %s1659_s11 }
 0xb72   :  { %p1323_p9 = pnand %p1321_p8, %p1318_p7 }
 0xb74   :  { %1326 = shalt.err (!%p1323_p9)
}
 0xb75   :  { %1051 = dma.vmem_to_hbm [thread:$0]  %s1049_s21, 32, %s1659_s11, [#allocation4]  }
 0xb76   :  { %1331 = dma.done.wait [#allocation4], 32  }
 0xb77   :  { %1332 = vsyncadd [#allocation4], 4294967264 }
 0xb78   :  { %1055 = vsyncpa [#allocation3], 1 }
 0xb79   :  { %1056 = vsyncpa [#allocation6], 1 }
 0xb7a   :  { %1057 = vsyncpa [#allocation4], 1 }

</bundles_post_ra>
